<compile_context>
chip_gen: v7x
topology: tpu7x:2x2x1
jax: 0.10.0
libtpu: 0.0.40
codegen_flags: <defaults>
</compile_context>

<pallas_src>
import functools

import jax
import jax.numpy as jnp
from jax import lax
from jax.experimental import pallas as pl
from jax.experimental.pallas import tpu as pltpu

BN_EPS = 1e-5


def _encoder_kernel(x_ref, w_ref, p_ref, o_ref):
    """Single-block kernel (everything fits in VMEM at these sizes).

    x_ref: (B, KP)          input, lane-padded
    w_ref: (3, KP, KP)      stacked [w1 ; w2 ; whead], zero-padded
    p_ref: (8, KP)          rows = [b1, g1, be1, b2, g2, be2, bhead, 0]
    o_ref: (B, KP)          [mu | logsigma | 0-pad] lane-dense output
    """
    x = x_ref[...]

    # ---- layer 1: Linear -> BatchNorm1d (batch stats, f32) -> ReLU ----
    h = jnp.dot(x, w_ref[0], preferred_element_type=jnp.float32) + p_ref[0:1, :]
    s1 = jnp.mean(h, axis=0, keepdims=True)           # E[h]
    s2 = jnp.mean(h * h, axis=0, keepdims=True)       # E[h^2] (independent reductions)
    v = jnp.maximum(s2 - s1 * s1, 0.0)                 # biased variance, clamped
    h = (h - s1) * lax.rsqrt(v + BN_EPS) * p_ref[1:2, :] + p_ref[2:3, :]
    h = jnp.maximum(h, 0.0)

    # ---- layer 2: Linear -> BatchNorm1d (batch stats, f32) -> ReLU ----
    h2 = jnp.dot(h, w_ref[1], preferred_element_type=jnp.float32) + p_ref[3:4, :]
    t1 = jnp.mean(h2, axis=0, keepdims=True)
    t2 = jnp.mean(h2 * h2, axis=0, keepdims=True)
    v2 = jnp.maximum(t2 - t1 * t1, 0.0)
    h2 = (h2 - t1) * lax.rsqrt(v2 + BN_EPS) * p_ref[4:5, :] + p_ref[5:6, :]
    h2 = jnp.maximum(h2, 0.0)

    # ---- fused heads: one MXU pass, one lane-dense (B, KP) unmasked store ----
    o_ref[...] = (jnp.dot(h2, w_ref[2], preferred_element_type=jnp.float32)
                  + p_ref[6:7, :])


def _round_up_128(n):
    return max(128, ((n + 127) // 128) * 128)


def pack_encoder_params(params):
    """One-time packing/padding of all parameters (hoisted out of the hot path).

    Returns (w_stack, p_all):
      w_stack: (3, KP, KP) f32  = [w1 ; w2 ; [wmu|wls]], zero-padded
      p_all:   (8, KP)     f32  = [b1, g1, be1, b2, g2, be2, [bmu|bls], 0]
    Zero padding of bias/gamma/beta keeps padded columns exactly zero through
    BN + ReLU, so numerics match the unpadded model.
    """
    d_in, h = params["w1"].shape
    n_latent = params["wmu"].shape[1]
    kp = max(_round_up_128(d_in), _round_up_128(h), _round_up_128(2 * n_latent))

    def pad2(a):  # pad a 2-D array to (KP, KP)
        return jnp.pad(a, ((0, kp - a.shape[0]), (0, kp - a.shape[1])))

    def pad_row(a):  # pad a (1, n) row to (1, KP)
        return jnp.pad(a, ((0, 0), (0, kp - a.shape[1])))

    whead = jnp.concatenate([params["wmu"], params["wls"]], axis=1)   # (H, 2n)
    bhead = jnp.concatenate([params["bmu"], params["bls"]], axis=1)   # (1, 2n)

    w_stack = jnp.stack([pad2(params["w1"]), pad2(params["w2"]), pad2(whead)])
    p_all = jnp.concatenate(
        [pad_row(params["b1"]), pad_row(params["g1"]), pad_row(params["be1"]),
         pad_row(params["b2"]), pad_row(params["g2"]), pad_row(params["be2"]),
         pad_row(bhead), jnp.zeros((1, kp), jnp.float32)], axis=0)
    return jax.device_put(w_stack), jax.device_put(p_all)


@functools.partial(jax.jit, static_argnames=("n_latent",))
def encoder_forward(x, w_stack, p_all, *, n_latent):
    """x: [B, D_in] f32; pre-packed (w_stack, p_all).  Returns (z_mu, z_logsigma)."""
    B, d_in = x.shape
    kp = w_stack.shape[-1]

    # Only per-call layout op: lane-pad x so its load is a full-lane vld.
    xp = jnp.pad(x, ((0, 0), (0, kp - d_in)))

    vmem = pl.BlockSpec(memory_space=pltpu.MemorySpace.VMEM)
    cost = pl.CostEstimate(
        flops=2 * B * kp * kp * 3,
        transcendentals=2 * kp,                       # two rsqrt rows
        bytes_accessed=4 * (B * kp + 3 * kp * kp + 8 * kp + B * kp))

    out = pl.pallas_call(
        _encoder_kernel,
        out_shape=jax.ShapeDtypeStruct((B, kp), jnp.float32),
        in_specs=[vmem, vmem, vmem],
        out_specs=vmem,
        cost_estimate=cost,
    )(xp, w_stack, p_all)

    return out[:, :n_latent], out[:, n_latent:2 * n_latent]


# ----------------------------- test harness ------------------------------

def _uniform(key, shape, bound):
    return jax.random.uniform(key, shape, jnp.float32, -bound, bound)


def make_params(key, d_in, h, n_latent):
    """Deterministic synthetic parameters (PyTorch-style Linear init ranges)."""
    ks = jax.random.split(key, 8)
    p = {}
    b1 = 1.0 / jnp.sqrt(d_in)
    p["w1"] = _uniform(ks[0], (d_in, h), b1)
    p["b1"] = _uniform(ks[1], (1, h), b1)
    p["g1"] = 1.0 + 0.05 * jnp.arange(h, dtype=jnp.float32).reshape(1, h) / h
    p["be1"] = 0.01 * jnp.arange(h, dtype=jnp.float32).reshape(1, h) / h
    b2 = 1.0 / jnp.sqrt(h)
    p["w2"] = _uniform(ks[2], (h, h), b2)
    p["b2"] = _uniform(ks[3], (1, h), b2)
    p["g2"] = 1.0 - 0.03 * jnp.arange(h, dtype=jnp.float32).reshape(1, h) / h
    p["be2"] = -0.02 * jnp.arange(h, dtype=jnp.float32).reshape(1, h) / h
    p["wmu"] = _uniform(ks[4], (h, n_latent), b2)
    p["bmu"] = _uniform(ks[5], (1, n_latent), b2)
    p["wls"] = _uniform(ks[6], (h, n_latent), b2)
    p["bls"] = _uniform(ks[7], (1, n_latent), b2)
    return p


def encoder_ref(x, p):
    """Pure-JAX reference of the same forward pass (for validation)."""
    def bn_relu(h, g, be):
        m = jnp.mean(h, axis=0, keepdims=True)
        v = jnp.mean((h - m) ** 2, axis=0, keepdims=True)   # biased variance
        return jnp.maximum((h - m) / jnp.sqrt(v + BN_EPS) * g + be, 0.0)

    h = bn_relu(x @ p["w1"] + p["b1"], p["g1"], p["be1"])
    h = bn_relu(h @ p["w2"] + p["b2"], p["g2"], p["be2"])
    return h @ p["wmu"] + p["bmu"], h @ p["wls"] + p["bls"]


if __name__ == "__main__":
    # Small shapes consistent with the module: arch=[32, 64, 64], n_latent=2.
    B, D_IN, H, N_LATENT = 8, 32, 64, 2

    key = jax.random.PRNGKey(0)
    kx, kp_key = jax.random.split(key)
    x = jax.random.normal(kx, (B, D_IN), dtype=jnp.float32)
    params = make_params(kp_key, D_IN, H, N_LATENT)

    # One-time packing (hoisted out of the per-call path).
    w_stack, p_all = pack_encoder_params(params)

    z_mu, z_logsigma = encoder_forward(x, w_stack, p_all, n_latent=N_LATENT)
    jax.block_until_ready((z_mu, z_logsigma))

    r_mu, r_ls = encoder_ref(x, params)
    assert z_mu.shape == (B, N_LATENT) and z_logsigma.shape == (B, N_LATENT)
    assert jnp.allclose(z_mu, r_mu, atol=1e-4, rtol=1e-4)
    assert jnp.allclose(z_logsigma, r_ls, atol=1e-4, rtol=1e-4)

    # TODO(synk): BatchNorm running_mean/running_var buffer updates (a PyTorch
    # training-mode side effect) are not produced; only the forward outputs are.

    print("KERNEL_OK")
</pallas_src>

<mosaic_0001>
module attributes {stable_mosaic.version = 11 : i64} {
  func.func @_encoder_kernel(%arg0: memref<8x128xf32, #tpu.memory_space<vmem>>, %arg1: memref<3x128x128xf32, #tpu.memory_space<vmem>>, %arg2: memref<8x128xf32, #tpu.memory_space<vmem>>, %arg3: memref<8x128xf32, #tpu.memory_space<vmem>>) attributes {dimension_semantics = [], scalar_prefetch = 0 : i64, scratch_operands = 0 : i64, tpu.core_type = #tpu.core_type<tc>} {
    %c0 = arith.constant 0 : index
    %c0_0 = arith.constant 0 : index
    %0 = vector.load %arg0[%c0, %c0_0] : memref<8x128xf32, #tpu.memory_space<vmem>>, vector<8x128xf32>
    %c0_1 = arith.constant 0 : index
    %c0_2 = arith.constant 0 : index
    %c0_3 = arith.constant 0 : index
    %1 = vector.load %arg1[%c0_1, %c0_2, %c0_3] : memref<3x128x128xf32, #tpu.memory_space<vmem>>, vector<1x128x128xf32>
    %2 = vector.shape_cast %1 : vector<1x128x128xf32> to vector<128x128xf32>
    %cst = arith.constant dense<0.000000e+00> : vector<8x128xf32>
    %3 = tpu.matmul %0, %2, %cst {dimension_numbers = #tpu.dot_dimension_numbers<[1], [0], [0], [1], [0, 0, 1, 1], [], []>} : vector<8x128xf32>, vector<128x128xf32>, vector<8x128xf32> -> vector<8x128xf32>
    %c0_4 = arith.constant 0 : index
    %c0_5 = arith.constant 0 : index
    %4 = vector.load %arg2[%c0_4, %c0_5] : memref<8x128xf32, #tpu.memory_space<vmem>>, vector<1x128xf32>
    %5 = vector.broadcast %4 : vector<1x128xf32> to vector<8x128xf32>
    %6 = arith.addf %3, %5 : vector<8x128xf32>
    %cst_6 = arith.constant dense<0.000000e+00> : vector<128xf32>
    %7 = vector.multi_reduction <add>, %6, %cst_6 [0] : vector<8x128xf32> to vector<128xf32>
    %8 = vector.shape_cast %7 : vector<128xf32> to vector<1x128xf32>
    %cst_7 = arith.constant 8.000000e+00 : f32
    %9 = vector.broadcast %cst_7 : f32 to vector<1x128xf32>
    %10 = arith.divf %8, %9 : vector<1x128xf32>
    %11 = arith.mulf %6, %6 : vector<8x128xf32>
    %cst_8 = arith.constant dense<0.000000e+00> : vector<128xf32>
    %12 = vector.multi_reduction <add>, %11, %cst_8 [0] : vector<8x128xf32> to vector<128xf32>
    %13 = vector.shape_cast %12 : vector<128xf32> to vector<1x128xf32>
    %cst_9 = arith.constant 8.000000e+00 : f32
    %14 = vector.broadcast %cst_9 : f32 to vector<1x128xf32>
    %15 = arith.divf %13, %14 : vector<1x128xf32>
    %16 = arith.mulf %10, %10 : vector<1x128xf32>
    %17 = arith.subf %15, %16 : vector<1x128xf32>
    %cst_10 = arith.constant 0.000000e+00 : f32
    %18 = vector.broadcast %cst_10 : f32 to vector<1x128xf32>
    %19 = arith.maximumf %17, %18 : vector<1x128xf32>
    %20 = vector.broadcast %10 : vector<1x128xf32> to vector<8x128xf32>
    %21 = arith.subf %6, %20 : vector<8x128xf32>
    %cst_11 = arith.constant 9.99999974E-6 : f32
    %22 = vector.broadcast %cst_11 : f32 to vector<1x128xf32>
    %23 = arith.addf %19, %22 : vector<1x128xf32>
    %24 = math.rsqrt %23 : vector<1x128xf32>
    %25 = vector.broadcast %24 : vector<1x128xf32> to vector<8x128xf32>
    %26 = arith.mulf %21, %25 : vector<8x128xf32>
    %c1 = arith.constant 1 : index
    %c0_12 = arith.constant 0 : index
    %27 = vector.load %arg2[%c1, %c0_12] : memref<8x128xf32, #tpu.memory_space<vmem>>, vector<1x128xf32>
    %28 = vector.broadcast %27 : vector<1x128xf32> to vector<8x128xf32>
    %29 = arith.mulf %26, %28 : vector<8x128xf32>
    %c2 = arith.constant 2 : index
    %c0_13 = arith.constant 0 : index
    %30 = vector.load %arg2[%c2, %c0_13] : memref<8x128xf32, #tpu.memory_space<vmem>>, vector<1x128xf32>
    %31 = vector.broadcast %30 : vector<1x128xf32> to vector<8x128xf32>
    %32 = arith.addf %29, %31 : vector<8x128xf32>
    %cst_14 = arith.constant 0.000000e+00 : f32
    %33 = vector.broadcast %cst_14 : f32 to vector<8x128xf32>
    %34 = arith.maximumf %32, %33 : vector<8x128xf32>
    %c1_15 = arith.constant 1 : index
    %c0_16 = arith.constant 0 : index
    %c0_17 = arith.constant 0 : index
    %35 = vector.load %arg1[%c1_15, %c0_16, %c0_17] : memref<3x128x128xf32, #tpu.memory_space<vmem>>, vector<1x128x128xf32>
    %36 = vector.shape_cast %35 : vector<1x128x128xf32> to vector<128x128xf32>
    %cst_18 = arith.constant dense<0.000000e+00> : vector<8x128xf32>
    %37 = tpu.matmul %34, %36, %cst_18 {dimension_numbers = #tpu.dot_dimension_numbers<[1], [0], [0], [1], [0, 0, 1, 1], [], []>} : vector<8x128xf32>, vector<128x128xf32>, vector<8x128xf32> -> vector<8x128xf32>
    %c3 = arith.constant 3 : index
    %c0_19 = arith.constant 0 : index
    %38 = vector.load %arg2[%c3, %c0_19] : memref<8x128xf32, #tpu.memory_space<vmem>>, vector<1x128xf32>
    %39 = vector.broadcast %38 : vector<1x128xf32> to vector<8x128xf32>
    %40 = arith.addf %37, %39 : vector<8x128xf32>
    %cst_20 = arith.constant dense<0.000000e+00> : vector<128xf32>
    %41 = vector.multi_reduction <add>, %40, %cst_20 [0] : vector<8x128xf32> to vector<128xf32>
    %42 = vector.shape_cast %41 : vector<128xf32> to vector<1x128xf32>
    %cst_21 = arith.constant 8.000000e+00 : f32
    %43 = vector.broadcast %cst_21 : f32 to vector<1x128xf32>
    %44 = arith.divf %42, %43 : vector<1x128xf32>
    %45 = arith.mulf %40, %40 : vector<8x128xf32>
    %cst_22 = arith.constant dense<0.000000e+00> : vector<128xf32>
    %46 = vector.multi_reduction <add>, %45, %cst_22 [0] : vector<8x128xf32> to vector<128xf32>
    %47 = vector.shape_cast %46 : vector<128xf32> to vector<1x128xf32>
    %cst_23 = arith.constant 8.000000e+00 : f32
    %48 = vector.broadcast %cst_23 : f32 to vector<1x128xf32>
    %49 = arith.divf %47, %48 : vector<1x128xf32>
    %50 = arith.mulf %44, %44 : vector<1x128xf32>
    %51 = arith.subf %49, %50 : vector<1x128xf32>
    %cst_24 = arith.constant 0.000000e+00 : f32
    %52 = vector.broadcast %cst_24 : f32 to vector<1x128xf32>
    %53 = arith.maximumf %51, %52 : vector<1x128xf32>
    %54 = vector.broadcast %44 : vector<1x128xf32> to vector<8x128xf32>
    %55 = arith.subf %40, %54 : vector<8x128xf32>
    %cst_25 = arith.constant 9.99999974E-6 : f32
    %56 = vector.broadcast %cst_25 : f32 to vector<1x128xf32>
    %57 = arith.addf %53, %56 : vector<1x128xf32>
    %58 = math.rsqrt %57 : vector<1x128xf32>
    %59 = vector.broadcast %58 : vector<1x128xf32> to vector<8x128xf32>
    %60 = arith.mulf %55, %59 : vector<8x128xf32>
    %c4 = arith.constant 4 : index
    %c0_26 = arith.constant 0 : index
    %61 = vector.load %arg2[%c4, %c0_26] : memref<8x128xf32, #tpu.memory_space<vmem>>, vector<1x128xf32>
    %62 = vector.broadcast %61 : vector<1x128xf32> to vector<8x128xf32>
    %63 = arith.mulf %60, %62 : vector<8x128xf32>
    %c5 = arith.constant 5 : index
    %c0_27 = arith.constant 0 : index
    %64 = vector.load %arg2[%c5, %c0_27] : memref<8x128xf32, #tpu.memory_space<vmem>>, vector<1x128xf32>
    %65 = vector.broadcast %64 : vector<1x128xf32> to vector<8x128xf32>
    %66 = arith.addf %63, %65 : vector<8x128xf32>
    %cst_28 = arith.constant 0.000000e+00 : f32
    %67 = vector.broadcast %cst_28 : f32 to vector<8x128xf32>
    %68 = arith.maximumf %66, %67 : vector<8x128xf32>
    %c2_29 = arith.constant 2 : index
    %c0_30 = arith.constant 0 : index
    %c0_31 = arith.constant 0 : index
    %69 = vector.load %arg1[%c2_29, %c0_30, %c0_31] : memref<3x128x128xf32, #tpu.memory_space<vmem>>, vector<1x128x128xf32>
    %70 = vector.shape_cast %69 : vector<1x128x128xf32> to vector<128x128xf32>
    %cst_32 = arith.constant dense<0.000000e+00> : vector<8x128xf32>
    %71 = tpu.matmul %68, %70, %cst_32 {dimension_numbers = #tpu.dot_dimension_numbers<[1], [0], [0], [1], [0, 0, 1, 1], [], []>} : vector<8x128xf32>, vector<128x128xf32>, vector<8x128xf32> -> vector<8x128xf32>
    %c6 = arith.constant 6 : index
    %c0_33 = arith.constant 0 : index
    %72 = vector.load %arg2[%c6, %c0_33] : memref<8x128xf32, #tpu.memory_space<vmem>>, vector<1x128xf32>
    %73 = vector.broadcast %72 : vector<1x128xf32> to vector<8x128xf32>
    %74 = arith.addf %71, %73 : vector<8x128xf32>
    %c0_34 = arith.constant 0 : index
    %c0_35 = arith.constant 0 : index
    %75 = vector.load %arg3[%c0_34, %c0_35] : memref<8x128xf32, #tpu.memory_space<vmem>>, vector<8x128xf32>
    tpu.vector_store %arg3[%c0_34, %c0_35], %74 {strides = array<i32>} : memref<8x128xf32, #tpu.memory_space<vmem>>, vector<8x128xf32>,
    return
  }
}

</mosaic_0001>

<bundles_post_ra>
// kernel: encoder_forward.1
= control target key start
LH: loop header
LB: loop body
LE: loop exit
PB: predicated region body
PF: predicated region fallthrough
CT: control target
= control target key end

     0   :  { %8 = vsyncpa [#allocation3], 0  ;;  %s650_s12 = smov [#allocation2]   ;;  %s742_s0 = inlined_call_operand.vmem [shape: f32[8,128], index: 0, kind: input, shape index: {}]   ;;  %s743_s1 = inlined_call_operand.hbm [shape: f32[3,128,128], index: 1, kind: input, shape index: {}]   ;;  %s744_s2 = inlined_call_operand.vmem [shape: f32[8,128], index: 2, kind: input, shape index: {}]   ;;  %s745_s3 = inlined_call_operand.vmem [shape: f32[8,128], index: 3, kind: output, shape index: {}]  }
   0x1   :  { %s16_s13 = sshll.u32 %s650_s12, 4  ;;  %s626_s16 = scalar_lea.hbm %s743_s1, 6144  ;;  %s17_s13 = int_to_ptr.vmem [resolvable:$true] %s16_s13 }
   0x2   :  { %p627_p0 = scmp.ne.s32.totalorder %s743_s1, %s626_s16  ;;  %p630_p1 = scmp.lt.u32.totalorder %s626_s16, %s743_s1 }
   0x4   :  { %p632_p2 = pnand %p630_p1, %p627_p0 }
   0x6   :  { %635 = shalt.err (!%p632_p2)
}
   0x7   :  { %s636_s21 = scalar_lea.vmem %s17_s13, 6144  ;;  %p641_p4 = scmp.lt.s32.totalorder %s17_s13, %s17_s13 }
   0x8   :  { %p637_p3 = scmp.ne.s32.totalorder %s17_s13, %s636_s21  ;;  %p642_p5 = scmp.lt.s32.totalorder %s636_s21, %s636_s21 }
   0xa   :  { %p643_p6 = por %p642_p5, %p641_p4 }
   0xc   :  { %p644_p7 = pnand %p643_p6, %p637_p3 }
   0xe   :  { %647 = shalt.err (!%p644_p7)
}
   0xf   :  { %s651_s22 = smov 128   ;;  %s652_s23 = smov 8  }
  0x10   :  { %22 = dma.hbm_to_vmem [thread:$0]  %s743_s1, 6144, %s17_s13, [#allocation3], %s651_s22, %s651_s22, %s652_s23  }
  0x11   :  { %648 = dma.done.wait [#allocation3], 6144  }
  0x12   :  { %649 = vsyncadd [#allocation3], 4294961152  ;;  %v653_v0 = vmov 0.0|0.0   ;;  %vm654_vm0 = vmmov 0   ;;  %v655_v1 = vmov 0.0   ;;  %v29_v2 = vld [vmem:[#allocation2] sm:$0xff] }
  0x13   :  { %544 = vmatprep.subr.bf16.mxu0 %v653_v0  ;;  %471 = vmatprep.mubr.msk.f32.mxu0 %vm654_vm0, %v655_v1  ;;  %v30_v3 = vld [vmem:[#allocation2 + $0x8] sm:$0xff]  ;;  %v31_v4 = vld [vmem:[#allocation2 + $0x10] sm:$0xff]  ;;  %v32_v6 = vld [vmem:[#allocation2 + $0x18] sm:$0xff] }
  0x14   :  { %568 = vmatprep.subr.bf16.mxu1 %v653_v0  ;;  %506 = vmatprep.mubr.msk.f32.mxu1 %vm654_vm0, %v655_v1  ;;  %v545_v5 = vpack.c.bf16 %v30_v3, %v29_v2  ;;  %v548_v7 = vpack.c.bf16 %v32_v6, %v31_v4  ;;  %v33_v8 = vld [vmem:[#allocation2 + $0x20] sm:$0xff]  ;;  %v34_v9 = vld [vmem:[#allocation2 + $0x28] sm:$0xff]  ;;  %v35_v11 = vld [vmem:[#allocation2 + $0x30] sm:$0xff] }
  0x15   :  { %v551_v10 = vpack.c.bf16 %v34_v9, %v33_v8  ;;  %v36_v12 = vld [vmem:[#allocation2 + $0x38] sm:$0xff]  ;;  %v37_v14 = vld [vmem:[#allocation2 + $0x40] sm:$0xff]  ;;  %v38_v15 = vld [vmem:[#allocation2 + $0x48] sm:$0xff] }
  0x16   :  { %546 = vmatpush3.bf16.msra.mxu0 %v545_v5  ;;  %v554_v13 = vpack.c.bf16 %v36_v12, %v35_v11  ;;  %v557_v16 = vpack.c.bf16 %v38_v15, %v37_v14  ;;  %v39_v17 = vld [vmem:[#allocation2 + $0x50] sm:$0xff]  ;;  %v40_v18 = vld [vmem:[#allocation2 + $0x58] sm:$0xff]  ;;  %v41_v20 = vld [vmem:[#allocation2 + $0x60] sm:$0xff] }
  0x17   :  { %547 = vmatprep.subr.bf16.mxu0 %v653_v0  ;;  %v560_v19 = vpack.c.bf16 %v40_v18, %v39_v17  ;;  %v42_v21 = vld [vmem:[#allocation2 + $0x68] sm:$0xff]  ;;  %v43_v23 = vld [vmem:[#allocation2 + $0x70] sm:$0xff]  ;;  %v44_v24 = vld [vmem:[#allocation2 + $0x78] sm:$0xff] }
  0x18   :  { %v563_v22 = vpack.c.bf16 %v42_v21, %v41_v20  ;;  %v566_v25 = vpack.c.bf16 %v44_v24, %v43_v23  ;;  %v28_v26 = vld [vmem:[%s742_s0] sm:$0xff]  ;;  %v158_v28 = vld [vmem:[#allocation2 + $0x88] sm:$0xff]  ;;  %v159_v30 = vld [vmem:[#allocation2 + $0x90] sm:$0xff] }
  0x19   :  { %v157_v27 = vld [vmem:[#allocation2 + $0x80] sm:$0xff]  ;;  %v160_v31 = vld [vmem:[#allocation2 + $0x98] sm:$0xff]  ;;  %v162_v34 = vld [vmem:[#allocation2 + $0xa8] sm:$0xff] }
  0x1a   :  { %549 = vmatpush3.bf16.msra.mxu0 %v548_v7  ;;  %v569_v29 = vpack.c.bf16 %v158_v28, %v157_v27  ;;  %v572_v32 = vpack.c.bf16 %v160_v31, %v159_v30  ;;  %v161_v33 = vld [vmem:[#allocation2 + $0xa0] sm:$0xff]  ;;  %v163_v36 = vld [vmem:[#allocation2 + $0xb0] sm:$0xff]  ;;  %v164_v37 = vld [vmem:[#allocation2 + $0xb8] sm:$0xff] }
  0x1b   :  { %550 = vmatprep.subr.bf16.mxu0 %v653_v0  ;;  %v575_v35 = vpack.c.bf16 %v162_v34, %v161_v33  ;;  %v578_v38 = vpack.c.bf16 %v164_v37, %v163_v36  ;;  %v165_v39 = vld [vmem:[#allocation2 + $0xc0] sm:$0xff]  ;;  %v166_v40 = vld [vmem:[#allocation2 + $0xc8] sm:$0xff]  ;;  %v167_v42 = vld [vmem:[#allocation2 + $0xd0] sm:$0xff] }
  0x1c   :  { %570 = vmatpush3.bf16.msra.mxu1 %v569_v29  ;;  %v581_v41 = vpack.c.bf16 %v166_v40, %v165_v39  ;;  %v168_v43 = vld [vmem:[#allocation2 + $0xd8] sm:$0xff]  ;;  %v169_v45 = vld [vmem:[#allocation2 + $0xe0] sm:$0xff]  ;;  %v170_v46 = vld [vmem:[#allocation2 + $0xe8] sm:$0xff] }
  0x1d   :  { %571 = vmatprep.subr.bf16.mxu1 %v653_v0  ;;  %v584_v44 = vpack.c.bf16 %v168_v43, %v167_v42  ;;  %v587_v47 = vpack.c.bf16 %v170_v46, %v169_v45  ;;  %v171_v48 = vld [vmem:[#allocation2 + $0xf0] sm:$0xff]  ;;  %v172_v49 = vld [vmem:[#allocation2 + $0xf8] sm:$0xff]  ;;  %v381_v51 = vld [vmem:[%s744_s2] ss:$0 sm:$0xff] }
  0x1e   :  { %552 = vmatpush3.bf16.msra.mxu0 %v551_v10  ;;  %v590_v50 = vpack.c.bf16 %v172_v49, %v171_v48  ;;  %v383_v15 = vld [vmem:[%s744_s2 + $0x2] ss:$0 sm:$0xff]  ;;  %v285_v20 = vld [vmem:[#allocation2 + $0x108] sm:$0xff]  ;;  %v287_v23 = vld [vmem:[#allocation2 + $0x118] sm:$0xff] }
  0x1f   :  { %553 = vmatprep.subr.bf16.mxu0 %v653_v0  ;;  %v290_v28 = vld [vmem:[#allocation2 + $0x130] sm:$0xff]  ;;  %v291_v29 = vld [vmem:[#allocation2 + $0x138] sm:$0xff]  ;;  %v292_v31 = vld [vmem:[#allocation2 + $0x140] sm:$0xff] }
  0x20   :  { %573 = vmatpush3.bf16.msra.mxu1 %v572_v32  ;;  %v602_v30 = vpack.c.bf16 %v291_v29, %v290_v28  ;;  %v293_v32 = vld [vmem:[#allocation2 + $0x148] sm:$0xff]  ;;  %v294_v34 = vld [vmem:[#allocation2 + $0x150] sm:$0xff]  ;;  %v296_v37 = vld [vmem:[#allocation2 + $0x160] sm:$0xff] }
  0x21   :  { %574 = vmatprep.subr.bf16.mxu1 %v653_v0  ;;  %v605_v33 = vpack.c.bf16 %v293_v32, %v292_v31  ;;  %v298_v40 = vld [vmem:[#allocation2 + $0x170] sm:$0xff]  ;;  %v384_v43 = vld [vmem:[%s744_s2 + $0x3] ss:$0 sm:$0xff] }
  0x22   :  { %555 = vmatpush3.bf16.msra.mxu0 %v554_v13  ;;  %v382_v13 = vld [vmem:[%s744_s2 + $0x1] ss:$0 sm:$0xff] }
  0x23   :  { %556 = vmatprep.subr.bf16.mxu0 %v653_v0 }
  0x24   :  { %576 = vmatpush3.bf16.msra.mxu1 %v575_v35  ;;  %v295_v35 = vld [vmem:[#allocation2 + $0x158] sm:$0xff] }
  0x25   :  { %577 = vmatprep.subr.bf16.mxu1 %v653_v0  ;;  %v608_v36 = vpack.c.bf16 %v295_v35, %v294_v34 }
  0x26   :  { %558 = vmatpush3.bf16.msra.mxu0 %v557_v16 }
  0x27   :  { %559 = vmatprep.subr.bf16.mxu0 %v653_v0 }
  0x28   :  { %579 = vmatpush3.bf16.msra.mxu1 %v578_v38  ;;  %v297_v38 = vld [vmem:[#allocation2 + $0x168] sm:$0xff] }
  0x29   :  { %580 = vmatprep.subr.bf16.mxu1 %v653_v0  ;;  %v611_v39 = vpack.c.bf16 %v297_v38, %v296_v37 }
  0x2a   :  { %561 = vmatpush3.bf16.msra.mxu0 %v560_v19  ;;  %v284_v19 = vld [vmem:[#allocation2 + $0x100] sm:$0xff] }
  0x2b   :  { %562 = vmatprep.subr.bf16.mxu0 %v653_v0  ;;  %v593_v21 = vpack.c.bf16 %v285_v20, %v284_v19 }
  0x2c   :  { %582 = vmatpush3.bf16.msra.mxu1 %v581_v41  ;;  %v299_v41 = vld [vmem:[#allocation2 + $0x178] sm:$0xff] }
  0x2d   :  { %583 = vmatprep.subr.bf16.mxu1 %v653_v0  ;;  %v614_v42 = vpack.c.bf16 %v299_v41, %v298_v40 }
  0x2e   :  { %564 = vmatpush3.bf16.msra.mxu0 %v563_v22  ;;  %v286_v22 = vld [vmem:[#allocation2 + $0x110] sm:$0xff] }
  0x2f   :  { %565 = vmatprep.subr.bf16.mxu0 %v653_v0  ;;  %v596_v24 = vpack.c.bf16 %v287_v23, %v286_v22 }
  0x30   :  { %585 = vmatpush3.bf16.msra.mxu1 %v584_v44 }
  0x31   :  { %586 = vmatprep.subr.bf16.mxu1 %v653_v0 }
  0x32   :  { %567 = vmatpush3.bf16.msra.mxu0 %v566_v25  ;;  %v288_v25 = vld [vmem:[#allocation2 + $0x120] sm:$0xff] }
  0x33   :  { %592 = vmatprep.subr.bf16.mxu0 %v653_v0 }
  0x34   :  { %588 = vmatpush3.bf16.msra.mxu1 %v587_v47 }
  0x35   :  { %472 = vmatmul.mubr.f32.vlgmr.msra.gmra.mrb[0].mxu0 %v28_v26  ;;  %589 = vmatprep.subr.bf16.mxu1 %v653_v0  ;;  %v289_v26 = vld [vmem:[#allocation2 + $0x128] sm:$0xff] }
  0x36   :  { %541 = vmatprep.mubr.msk.f32.mxu0 %vm654_vm0, %v655_v1  ;;  %594 = vmatpush3.bf16.msra.mxu0 %v593_v21  ;;  %v599_v27 = vpack.c.bf16 %v289_v26, %v288_v25 }
  0x37   :  { %595 = vmatprep.subr.bf16.mxu0 %v653_v0 }
  0x38   :  { %591 = vmatpush3.bf16.msra.mxu1 %v590_v50 }
  0x3a   :  { %597 = vmatpush3.bf16.msra.mxu0 %v596_v24 }
  0x3b   :  { %598 = vmatprep.subr.bf16.mxu0 %v653_v0 }
  0x3e   :  { %600 = vmatpush3.bf16.msra.mxu0 %v599_v27 }
  0x3f   :  { %601 = vmatprep.subr.bf16.mxu0 %v653_v0 }
  0x42   :  { %603 = vmatpush3.bf16.msra.mxu0 %v602_v30 }
  0x43   :  { %604 = vmatprep.subr.bf16.mxu0 %v653_v0 }
  0x46   :  { %606 = vmatpush3.bf16.msra.mxu0 %v605_v33 }
  0x47   :  { %607 = vmatprep.subr.bf16.mxu0 %v653_v0 }
  0x4a   :  { %609 = vmatpush3.bf16.msra.mxu0 %v608_v36 }
  0x4b   :  { %610 = vmatprep.subr.bf16.mxu0 %v653_v0 }
  0x4e   :  { %612 = vmatpush3.bf16.msra.mxu0 %v611_v39 }
  0x4f   :  { %613 = vmatprep.subr.bf16.mxu0 %v653_v0 }
  0x52   :  { %615 = vmatpush3.bf16.msra.mxu0 %v614_v42 }
 0x108   :  { %v116_v52 = vpop.f32.mrb[0].mxu0 }
 0x109   :  { %v117_v53 = vadd.f32 %v381_v51, %v116_v52  ;;  %v473_v54 = vpop.f32.mrb[1].mxu0 }
 0x10b   :  { %v120_v55 = vrot.slane %v117_v53, 4  ;;  %v128_v56 = vmul.f32 %v117_v53, %v117_v53 }
 0x10d   :  { %v121_v57 = vadd.f32 %v120_v55, %v117_v53  ;;  %v129_v58 = vrot.slane %v128_v56, 4 }
 0x10f   :  { %v122_v59 = vrot.slane %v121_v57, 2  ;;  %v130_v60 = vadd.f32 %v129_v58, %v128_v56 }
 0x111   :  { %v123_v61 = vadd.f32 %v122_v59, %v121_v57  ;;  %v131_v62 = vrot.slane %v130_v60, 2 }
 0x113   :  { %v124_v63 = vrot.slane %v123_v61, 1  ;;  %v132_v1 = vadd.f32 %v131_v62, %v130_v60 }
 0x115   :  { %v125_v2 = vadd.f32 %v124_v63, %v123_v61  ;;  %v133_v3 = vrot.slane %v132_v1, 1 }
 0x117   :  { %v127_v4 = vmul.f32 0.125, %v125_v2  ;;  %v134_v5 = vadd.f32 %v133_v3, %v132_v1 }
 0x119   :  { %v135_v6 = vmul.f32 0.125, %v134_v5  ;;  %v136_v7 = vmul.f32 %v127_v4, %v127_v4  ;;  %v139_v11 = vsub.f32 %v117_v53, %v127_v4  ;;  %v385_v4 = vld [vmem:[%s744_s2 + $0x4] ss:$0 sm:$0xff] }
 0x11b   :  { %v137_v8 = vsub.f32 %v135_v6, %v136_v7  ;;  %v386_v6 = vld [vmem:[%s744_s2 + $0x5] ss:$0 sm:$0xff] }
 0x11d   :  { %v138_v9 = vmax.f32 %v137_v8, 0.0 }
 0x11f   :  { %v140_v10 = vadd.f32 1e-05, %v138_v9 }
 0x121   :  { %622 = vrsqrt.f32 %v140_v10  ;;  %v387_v10 = vld [vmem:[%s744_s2 + $0x6] ss:$0 sm:$0xff] }
 0x12b   :  { %v623_v12 = vpop.eup %622 }
 0x12c   :  { %v142_v14 = vmul.f32 %v623_v12, %v139_v11 }
 0x12e   :  { %v148_v16 = vmul.f32 %v382_v13, %v142_v14 }
 0x130   :  { %v154_v17 = vadd.f32 %v383_v15, %v148_v16 }
 0x132   :  { %v155_v18 = vmax.f32 %v154_v17, 0.0 }
 0x134   :  { %507 = vmatmul.mubr.f32.vlgmr.msra.gmra.mrb[0].mxu1 %v155_v18 }
 0x207   :  { %v244_v44 = vpop.f32.mrb[0].mxu1 }
 0x208   :  { %v245_v45 = vadd.f32 %v384_v43, %v244_v44  ;;  %v508_v46 = vpop.f32.mrb[1].mxu1 }
 0x20a   :  { %v248_v47 = vrot.slane %v245_v45, 4  ;;  %v255_v48 = vmul.f32 %v245_v45, %v245_v45 }
 0x20c   :  { %v249_v49 = vadd.f32 %v248_v47, %v245_v45  ;;  %v256_v50 = vrot.slane %v255_v48, 4 }
 0x20e   :  { %v250_v51 = vrot.slane %v249_v49, 2  ;;  %v257_v52 = vadd.f32 %v256_v50, %v255_v48 }
 0x210   :  { %v251_v53 = vadd.f32 %v250_v51, %v249_v49  ;;  %v258_v54 = vrot.slane %v257_v52, 2 }
 0x212   :  { %v252_v55 = vrot.slane %v251_v53, 1  ;;  %v259_v56 = vadd.f32 %v258_v54, %v257_v52 }
 0x214   :  { %v253_v57 = vadd.f32 %v252_v55, %v251_v53  ;;  %v260_v0 = vrot.slane %v259_v56, 1 }
 0x216   :  { %v254_v58 = vmul.f32 0.125, %v253_v57  ;;  %v261_v59 = vadd.f32 %v260_v0, %v259_v56 }
 0x218   :  { %v262_v60 = vmul.f32 0.125, %v261_v59  ;;  %v263_v61 = vmul.f32 %v254_v58, %v254_v58  ;;  %v266_v2 = vsub.f32 %v245_v45, %v254_v58 }
 0x21a   :  { %v264_v62 = vsub.f32 %v262_v60, %v263_v61 }
 0x21c   :  { %v265_v63 = vmax.f32 %v264_v62, 0.0 }
 0x21e   :  { %v267_v1 = vadd.f32 1e-05, %v265_v63 }
 0x220   :  { %624 = vrsqrt.f32 %v267_v1 }
 0x22a   :  { %v625_v3 = vpop.eup %624 }
 0x22b   :  { %v269_v5 = vmul.f32 %v625_v3, %v266_v2 }
 0x22d   :  { %v275_v7 = vmul.f32 %v385_v4, %v269_v5 }
 0x22f   :  { %v281_v8 = vadd.f32 %v386_v6, %v275_v7 }
 0x231   :  { %v282_v9 = vmax.f32 %v281_v8, 0.0 }
 0x233   :  { %542 = vmatmul.mubr.f32.vlgmr.msra.gmra.mrb[2].mxu0 %v282_v9 }
 0x306   :  { %v371_v11 = vpop.f32.mrb[2].mxu0 }
 0x307   :  { %v372_v12 = vadd.f32 %v387_v10, %v371_v11  ;;  %v543_v13 = vpop.f32.mrb[3].mxu0 }
 0x309   :  { %375 = vst [vmem:[%s745_s3] sm:$0xff] %v372_v12 }
 0x30a   :  { %380 = vsyncpa [#allocation3], 1 }

</bundles_post_ra>
